<compile_context>
chip_gen: v6e
topology: v6e:2x2x1
jax: 0.10.0
libtpu: 0.0.40
codegen_flags: <defaults>
</compile_context>

<pallas_src>
import functools

import jax
import jax.numpy as jnp
from jax.experimental import pallas as pl
from jax.experimental.pallas import tpu as pltpu


# ---------------------------------------------------------------------------
# Generation-aware VMEM / block-size policy.
# (vmem_limit_bytes, max_block_bytes, min_block_bytes, tensorcores_per_chip)
# ---------------------------------------------------------------------------
_GEN_POLICY = {
    "v7x": (48 << 20, 8 << 20, 2 << 20, 2),    # 64 MiB physical VMEM, 2 TCs/chip
    "v6e": (96 << 20, 16 << 20, 2 << 20, 1),   # 128 MiB physical VMEM
    "v5e": (96 << 20, 4 << 20, 1 << 20, 1),    # 128 MiB physical, ~0.82 TB/s HBM
    "unknown": (32 << 20, 4 << 20, 1 << 20, 1),
}


def _tpu_policy():
    try:
        kind = jax.devices()[0].device_kind.lower()
    except Exception:
        kind = ""
    if "v7" in kind or "7x" in kind:
        return _GEN_POLICY["v7x"]
    if "v6" in kind:
        return _GEN_POLICY["v6e"]
    if "v5" in kind:
        return _GEN_POLICY["v5e"]
    return _GEN_POLICY["unknown"]


def _pick_batch_block(n, per_row_bytes, weight_bytes, policy):
    """Batch rows per grid step for the single-pass kernel.

    Budget = (vmem_limit - resident weights - reserve) / 4, since x and out are
    each double-buffered.  On multi-TC chips (v7x) keep >= 2 steps per core for
    pipeline overlap, but never shrink blocks below min_block_bytes.
    """
    vmem_limit, max_block, min_block, n_cores = policy
    reserve = 2 << 20
    block_budget = min(max_block, (vmem_limit - 2 * weight_bytes - reserve) // 4)
    nb_budget = max(1, min(n, block_budget // per_row_bytes))
    if n_cores > 1:
        nb_steps = max(1, -(-n // (2 * n_cores)))          # -> >= 2 steps per core
        nb_min = max(1, -(-min_block // per_row_bytes))    # don't go below min_block
        return max(1, min(nb_budget, max(nb_min, nb_steps)))
    return nb_budget


# ---------------------------------------------------------------------------
# Single-pass kernel: whole (Nb, C, HW) slab in VMEM per step.
# ---------------------------------------------------------------------------
def channel_gate_kernel(x_ref, w1_ref, b1_ref, w2_ref, b2_ref, o_ref):
    # x_ref / o_ref : (Nb, C, HW)  -- HW on the lane axis
    # w1_ref: (C, Cr)  b1_ref: (1, Cr)  w2_ref: (Cr, C)  b2_ref: (1, C)
    nb, _, hw = x_ref.shape

    # One load of x feeds both reductions and the final multiply (the extra
    # VMEM read pass is hidden under the HBM DMA on all generations).
    x = x_ref[...]                                                # input dtype

    x_max = jnp.max(x, axis=-1)                                   # (Nb, C) exact
    x_mean = jnp.sum(x, axis=-1, dtype=jnp.float32) * (1.0 / hw)  # (Nb, C) f32 acc

    # Single MLP pass over both pooled vectors: (2*Nb, C).
    pooled = jnp.concatenate([x_max.astype(jnp.float32), x_mean], axis=0)

    w1 = w1_ref[...].astype(jnp.float32)
    b1 = b1_ref[...].astype(jnp.float32)
    w2 = w2_ref[...].astype(jnp.float32)
    b2 = b2_ref[...].astype(jnp.float32)

    h = jnp.dot(pooled, w1, preferred_element_type=jnp.float32) + b1   # (2*Nb, Cr)
    h = jnp.maximum(h, 0.0)
    att = jnp.dot(h, w2, preferred_element_type=jnp.float32) + b2      # (2*Nb, C)

    scale = jax.nn.sigmoid(att[:nb] + att[nb:])                  # (Nb, C)
    scale = scale.astype(x.dtype)[:, :, None]                    # broadcast over HW

    o_ref[...] = (x * scale).astype(o_ref.dtype)


# ---------------------------------------------------------------------------
# Fallback two-pass path: pooling kernel + plain-JAX MLP + scaling kernel.
# Used when a single (C, HW) row does not fit the VMEM budget.
# ---------------------------------------------------------------------------
def _pool_kernel(x_ref, max_ref, sum_ref, *, hw_total):
    # x_ref: (1, C, THW).  max_ref / sum_ref: (1, 1, C) f32 accumulators that
    # stay resident across the HW (reduction) grid axis.
    k = pl.program_id(1)
    thw = x_ref.shape[-1]
    x = x_ref[...].astype(jnp.float32)

    # Mask lanes past the true HW extent (partial last block).
    lane = jax.lax.broadcasted_iota(jnp.int32, x.shape, 2)
    valid = (k * thw + lane) < hw_total
    pmax = jnp.max(jnp.where(valid, x, -jnp.inf), axis=-1)[:, None, :]   # (1,1,C)
    psum = jnp.sum(jnp.where(valid, x, 0.0), axis=-1)[:, None, :]        # (1,1,C)

    @pl.when(k == 0)
    def _():
        max_ref[...] = pmax
        sum_ref[...] = psum

    @pl.when(k > 0)
    def _():
        max_ref[...] = jnp.maximum(max_ref[...], pmax)
        sum_ref[...] = sum_ref[...] + psum


def _scale_kernel(scale_ref, x_ref, o_ref):
    # scale_ref: (1, C, 1)   x_ref / o_ref: (1, C, THW)
    o_ref[...] = x_ref[...] * scale_ref[...]


def _channel_gate_two_pass(x, w1, b1, w2, b2, policy, hw_block=None):
    N, C, HW = x.shape
    vmem_limit, max_block, _min_block, _cores = policy
    itemsize = x.dtype.itemsize
    reserve = 2 << 20

    if hw_block is None:
        budget = max(C * 128 * itemsize, min(max_block, (vmem_limit - reserve) // 4))
        thw = max(128, (budget // (C * itemsize)) // 128 * 128)
    else:
        thw = hw_block
    thw = min(thw, HW) if HW >= 128 else HW   # multiple of 128, or the full dim

    grid = (N, pl.cdiv(HW, thw))

    pooled_max, pooled_sum = pl.pallas_call(
        functools.partial(_pool_kernel, hw_total=HW),
        out_shape=(jax.ShapeDtypeStruct((N, 1, C), jnp.float32),
                   jax.ShapeDtypeStruct((N, 1, C), jnp.float32)),
        grid_spec=pltpu.PrefetchScalarGridSpec(
            num_scalar_prefetch=0,
            grid=grid,
            in_specs=[pl.BlockSpec((1, C, thw), lambda n, k: (n, 0, k))],
            out_specs=(pl.BlockSpec((1, 1, C), lambda n, k: (n, 0, 0)),
                       pl.BlockSpec((1, 1, C), lambda n, k: (n, 0, 0))),
        ),
        compiler_params=pltpu.CompilerParams(
            dimension_semantics=("parallel", "arbitrary"),
            vmem_limit_bytes=vmem_limit,
        ),
    )(x)

    x_max = pooled_max.reshape(N, C)
    x_mean = pooled_sum.reshape(N, C) * (1.0 / HW)

    # Tiny MLP in plain JAX -- negligible next to the two HBM passes over x.
    def mlp(v):
        h = jnp.maximum(v @ w1.astype(jnp.float32) + b1.astype(jnp.float32), 0.0)
        return h @ w2.astype(jnp.float32) + b2.astype(jnp.float32)

    scale = jax.nn.sigmoid(mlp(x_max) + mlp(x_mean)).astype(x.dtype)
    scale = scale.reshape(N, C, 1)

    return pl.pallas_call(
        _scale_kernel,
        out_shape=jax.ShapeDtypeStruct((N, C, HW), x.dtype),
        grid_spec=pltpu.PrefetchScalarGridSpec(
            num_scalar_prefetch=0,
            grid=grid,
            in_specs=[pl.BlockSpec((1, C, 1), lambda n, k: (n, 0, 0)),
                      pl.BlockSpec((1, C, thw), lambda n, k: (n, 0, k))],
            out_specs=pl.BlockSpec((1, C, thw), lambda n, k: (n, 0, k)),
        ),
        compiler_params=pltpu.CompilerParams(
            dimension_semantics=("parallel", "parallel"),
            vmem_limit_bytes=vmem_limit,
        ),
    )(scale, x)


# ---------------------------------------------------------------------------
# Public wrapper.
# ---------------------------------------------------------------------------
def channel_gate(x_nchw, w1, b1, w2, b2, *, batch_block=None,
                 force_two_pass=False, hw_block=None):
    N, C, H, W = x_nchw.shape
    HW = H * W
    Cr = w1.shape[1]
    b1 = jnp.reshape(b1, (1, -1))
    b2 = jnp.reshape(b2, (1, -1))

    # Free reshape: NCHW -> (N, C, HW).  No transposes, no extra HBM traffic.
    x = x_nchw.reshape(N, C, HW)

    policy = _tpu_policy()
    vmem_limit, _max_block, _min_block, _cores = policy

    per_row_bytes = C * HW * x.dtype.itemsize
    weight_bytes = sum(int(a.size) * a.dtype.itemsize for a in (w1, b1, w2, b2))
    reserve = 2 << 20

    single_pass_fits = (4 * per_row_bytes + 2 * weight_bytes + reserve) <= vmem_limit
    if force_two_pass or not single_pass_fits:
        out = _channel_gate_two_pass(x, w1, b1, w2, b2, policy, hw_block=hw_block)
        return out.reshape(N, C, H, W)

    Nb = batch_block if batch_block is not None else _pick_batch_block(
        N, per_row_bytes, weight_bytes, policy)
    grid = (pl.cdiv(N, Nb),)   # partial last batch block is safe: rows independent

    out = pl.pallas_call(
        channel_gate_kernel,
        out_shape=jax.ShapeDtypeStruct((N, C, HW), x.dtype),
        grid_spec=pltpu.PrefetchScalarGridSpec(
            num_scalar_prefetch=0,
            grid=grid,
            in_specs=[
                pl.BlockSpec((Nb, C, HW), lambda n: (n, 0, 0)),
                pl.BlockSpec((C, Cr), lambda n: (0, 0)),
                pl.BlockSpec((1, Cr), lambda n: (0, 0)),
                pl.BlockSpec((Cr, C), lambda n: (0, 0)),
                pl.BlockSpec((1, C), lambda n: (0, 0)),
            ],
            out_specs=pl.BlockSpec((Nb, C, HW), lambda n: (n, 0, 0)),
        ),
        compiler_params=pltpu.CompilerParams(
            dimension_semantics=("parallel",),
            vmem_limit_bytes=vmem_limit,
        ),
    )(x, w1, b1, w2, b2)

    # Free reshape back to NCHW.
    return out.reshape(N, C, H, W)


def channel_gate_ref(x, w1, b1, w2, b2):
    """Pure-JAX reference matching the PyTorch forward."""
    x_max = jnp.max(x, axis=(2, 3))                  # (N, C)
    x_mean = jnp.mean(x, axis=(2, 3))                # (N, C)

    def mlp(v):
        return jnp.maximum(v @ w1 + b1, 0.0) @ w2 + b2

    scale = jax.nn.sigmoid(mlp(x_max) + mlp(x_mean))  # (N, C)
    return x * scale[:, :, None, None]


if __name__ == "__main__":
    # Shapes consistent with ChannelGate(gate_channels=32, reduction_ratio=4).
    N, C, H, W = 2, 32, 16, 16                       # HW = 256 -> lane-dense
    reduction_ratio = 4
    Cr = C // reduction_ratio

    key = jax.random.PRNGKey(0)
    kx, k1, k2, k3, k4, kx2 = jax.random.split(key, 6)

    # Deterministic synthetic Linear(C, Cr) / Linear(Cr, C) params, stored as
    # (in, out) so that y = v @ W + b.
    bound1 = 1.0 / jnp.sqrt(jnp.float32(C))
    bound2 = 1.0 / jnp.sqrt(jnp.float32(Cr))
    w1 = jax.random.uniform(k1, (C, Cr), jnp.float32, -bound1, bound1)
    b1 = jax.random.uniform(k2, (1, Cr), jnp.float32, -bound1, bound1)
    w2 = jax.random.uniform(k3, (Cr, C), jnp.float32, -bound2, bound2)
    b2 = jax.random.uniform(k4, (1, C), jnp.float32, -bound2, bound2)

    # 1) Main single-pass path (device-aware block sizing).
    x = jax.random.normal(kx, (N, C, H, W), dtype=jnp.float32)
    out = jax.block_until_ready(channel_gate(x, w1, b1, w2, b2))
    exp = channel_gate_ref(x, w1, b1[0], w2, b2[0])
    assert out.shape == (N, C, H, W)
    assert jnp.allclose(out, exp, atol=1e-5, rtol=1e-5), "single-pass mismatch"

    # 2) cdiv grid with a partial batch block (N=3, Nb=2) and HW not a
    #    multiple of 128 (16x18 = 288).
    N2, H2, W2 = 3, 16, 18
    x2 = jax.random.normal(kx2, (N2, C, H2, W2), dtype=jnp.float32)
    out2 = jax.block_until_ready(channel_gate(x2, w1, b1, w2, b2, batch_block=2))
    exp2 = channel_gate_ref(x2, w1, b1[0], w2, b2[0])
    assert jnp.allclose(out2, exp2, atol=1e-5, rtol=1e-5), "partial-block mismatch"

    # 3) Two-pass fallback (tiled + masked HW reduction), forced at small shapes.
    out3 = jax.block_until_ready(
        channel_gate(x2, w1, b1, w2, b2, force_two_pass=True, hw_block=128))
    assert jnp.allclose(out3, exp2, atol=1e-5, rtol=1e-5), "two-pass mismatch"

    print("KERNEL_OK")
</pallas_src>

<mosaic_0001>
module attributes {stable_mosaic.version = 11 : i64} {
  func.func @channel_gate_kernel(%arg0: i32, %arg1: memref<2x32x256xf32, #tpu.memory_space<vmem>>, %arg2: memref<32x8xf32, #tpu.memory_space<vmem>>, %arg3: memref<1x8xf32, #tpu.memory_space<vmem>>, %arg4: memref<8x32xf32, #tpu.memory_space<vmem>>, %arg5: memref<1x32xf32, #tpu.memory_space<vmem>>, %arg6: memref<2x32x256xf32, #tpu.memory_space<vmem>>) attributes {dimension_semantics = [#tpu.dimension_semantics<parallel>], iteration_bounds = array<i64: 1>, scalar_prefetch = 0 : i64, scratch_operands = 0 : i64, tpu.core_type = #tpu.core_type<tc>, window_params = [{transform_indices = @transform_0, window_bounds = array<i64: 2, 32, 256>}, {pipeline_mode = #tpu.pipeline_mode<synchronous>, transform_indices = @transform_1, window_bounds = array<i64: 32, 8>}, {pipeline_mode = #tpu.pipeline_mode<synchronous>, transform_indices = @transform_2, window_bounds = array<i64: 1, 8>}, {pipeline_mode = #tpu.pipeline_mode<synchronous>, transform_indices = @transform_3, window_bounds = array<i64: 8, 32>}, {pipeline_mode = #tpu.pipeline_mode<synchronous>, transform_indices = @transform_4, window_bounds = array<i64: 1, 32>}, {transform_indices = @transform_5, window_bounds = array<i64: 2, 32, 256>}]} {
    %c0 = arith.constant 0 : index
    %c0_0 = arith.constant 0 : index
    %c0_1 = arith.constant 0 : index
    %0 = vector.load %arg1[%c0, %c0_0, %c0_1] : memref<2x32x256xf32, #tpu.memory_space<vmem>>, vector<2x32x256xf32>
    %cst = arith.constant dense<0xFF800000> : vector<2x32xf32>
    %1 = vector.multi_reduction <maximumf>, %0, %cst [2] : vector<2x32x256xf32> to vector<2x32xf32>
    %cst_2 = arith.constant dense<0.000000e+00> : vector<2x32xf32>
    %2 = vector.multi_reduction <add>, %0, %cst_2 [2] : vector<2x32x256xf32> to vector<2x32xf32>
    %cst_3 = arith.constant 3.906250e-03 : f32
    %3 = vector.broadcast %cst_3 : f32 to vector<2x32xf32>
    %4 = arith.mulf %2, %3 : vector<2x32xf32>
    %5 = tpu.concatenate %1, %4 in 0 : vector<2x32xf32>, vector<2x32xf32> -> vector<4x32xf32>
    %c0_4 = arith.constant 0 : index
    %c0_5 = arith.constant 0 : index
    %6 = vector.load %arg2[%c0_4, %c0_5] : memref<32x8xf32, #tpu.memory_space<vmem>>, vector<32x8xf32>
    %c0_6 = arith.constant 0 : index
    %c0_7 = arith.constant 0 : index
    %7 = vector.load %arg3[%c0_6, %c0_7] : memref<1x8xf32, #tpu.memory_space<vmem>>, vector<1x8xf32>
    %c0_8 = arith.constant 0 : index
    %c0_9 = arith.constant 0 : index
    %8 = vector.load %arg4[%c0_8, %c0_9] : memref<8x32xf32, #tpu.memory_space<vmem>>, vector<8x32xf32>
    %c0_10 = arith.constant 0 : index
    %c0_11 = arith.constant 0 : index
    %9 = vector.load %arg5[%c0_10, %c0_11] : memref<1x32xf32, #tpu.memory_space<vmem>>, vector<1x32xf32>
    %cst_12 = arith.constant dense<0.000000e+00> : vector<4x8xf32>
    %10 = tpu.matmul %5, %6, %cst_12 {dimension_numbers = #tpu.dot_dimension_numbers<[1], [0], [0], [1], [0, 0, 1, 1], [], []>} : vector<4x32xf32>, vector<32x8xf32>, vector<4x8xf32> -> vector<4x8xf32>
    %11 = vector.broadcast %7 : vector<1x8xf32> to vector<4x8xf32>
    %12 = arith.addf %10, %11 : vector<4x8xf32>
    %cst_13 = arith.constant 0.000000e+00 : f32
    %13 = vector.broadcast %cst_13 : f32 to vector<4x8xf32>
    %14 = arith.maximumf %12, %13 : vector<4x8xf32>
    %cst_14 = arith.constant dense<0.000000e+00> : vector<4x32xf32>
    %15 = tpu.matmul %14, %8, %cst_14 {dimension_numbers = #tpu.dot_dimension_numbers<[1], [0], [0], [1], [0, 0, 1, 1], [], []>} : vector<4x8xf32>, vector<8x32xf32>, vector<4x32xf32> -> vector<4x32xf32>
    %16 = vector.broadcast %9 : vector<1x32xf32> to vector<4x32xf32>
    %17 = arith.addf %15, %16 : vector<4x32xf32>
    %18 = vector.extract_strided_slice %17 {offsets = [0, 0], sizes = [2, 32], strides = [1, 1]} : vector<4x32xf32> to vector<2x32xf32>
    %19 = vector.extract_strided_slice %17 {offsets = [2, 0], sizes = [2, 32], strides = [1, 1]} : vector<4x32xf32> to vector<2x32xf32>
    %20 = arith.addf %18, %19 : vector<2x32xf32>
    %21 = arith.negf %20 : vector<2x32xf32>
    %22 = math.exp %21 : vector<2x32xf32>
    %cst_15 = arith.constant 1.000000e+00 : f32
    %23 = vector.broadcast %cst_15 : f32 to vector<2x32xf32>
    %24 = arith.addf %23, %22 : vector<2x32xf32>
    %25 = arith.divf %23, %24 : vector<2x32xf32>
    %26 = vector.shape_cast %25 : vector<2x32xf32> to vector<2x32x1xf32>
    %27 = vector.broadcast %26 : vector<2x32x1xf32> to vector<2x32x256xf32>
    %28 = arith.mulf %0, %27 : vector<2x32x256xf32>
    %c0_16 = arith.constant 0 : index
    %c0_17 = arith.constant 0 : index
    %c0_18 = arith.constant 0 : index
    %29 = vector.load %arg6[%c0_16, %c0_17, %c0_18] : memref<2x32x256xf32, #tpu.memory_space<vmem>>, vector<2x32x256xf32>
    tpu.vector_store %arg6[%c0_16, %c0_17, %c0_18], %28 {strides = array<i32>} : memref<2x32x256xf32, #tpu.memory_space<vmem>>, vector<2x32x256xf32>,
    return
  }
  func.func @transform_0(%arg0: i32) -> (i32, i32, i32) {
    %c0_i32 = arith.constant 0 : i32
    %c0_i32_0 = arith.constant 0 : i32
    %c0_i32_1 = arith.constant 0 : i32
    return %arg0, %c0_i32, %c0_i32_0 : i32, i32, i32
  }
  func.func @transform_1(%arg0: i32) -> (i32, i32) {
    %c0_i32 = arith.constant 0 : i32
    %c0_i32_0 = arith.constant 0 : i32
    %c0_i32_1 = arith.constant 0 : i32
    return %c0_i32, %c0_i32_0 : i32, i32
  }
  func.func @transform_2(%arg0: i32) -> (i32, i32) {
    %c0_i32 = arith.constant 0 : i32
    %c0_i32_0 = arith.constant 0 : i32
    %c0_i32_1 = arith.constant 0 : i32
    return %c0_i32, %c0_i32_0 : i32, i32
  }
  func.func @transform_3(%arg0: i32) -> (i32, i32) {
    %c0_i32 = arith.constant 0 : i32
    %c0_i32_0 = arith.constant 0 : i32
    %c0_i32_1 = arith.constant 0 : i32
    return %c0_i32, %c0_i32_0 : i32, i32
  }
  func.func @transform_4(%arg0: i32) -> (i32, i32) {
    %c0_i32 = arith.constant 0 : i32
    %c0_i32_0 = arith.constant 0 : i32
    %c0_i32_1 = arith.constant 0 : i32
    return %c0_i32, %c0_i32_0 : i32, i32
  }
  func.func @transform_5(%arg0: i32) -> (i32, i32, i32) {
    %c0_i32 = arith.constant 0 : i32
    %c0_i32_0 = arith.constant 0 : i32
    %c0_i32_1 = arith.constant 0 : i32
    return %arg0, %c0_i32, %c0_i32_0 : i32, i32, i32
  }
}

</mosaic_0001>

<bundles_post_ra>
// kernel: tpu_custom_call.1
= control target key start
LH: loop header
LB: loop body
LE: loop exit
PB: predicated region body
PF: predicated region fallthrough
CT: control target
= control target key end

     0   :  { %10 = vsyncpa [#allocation3], 0  ;;  %s733_s0 = inlined_call_operand.hbm [shape: f32[2,32,256], index: 0, kind: input, shape index: {}]   ;;  %s734_s1 = inlined_call_operand.vmem [shape: f32[32,8], index: 1, kind: input, shape index: {}]   ;;  %s735_s2 = inlined_call_operand.vmem [shape: f32[1,8], index: 2, kind: input, shape index: {}]   ;;  %s736_s3 = inlined_call_operand.vmem [shape: f32[8,32], index: 3, kind: input, shape index: {}]   ;;  %s737_s4 = inlined_call_operand.vmem [shape: f32[1,32], index: 4, kind: input, shape index: {}]   ;;  %s738_s5 = inlined_call_operand.hbm [shape: f32[2,32,256], index: 5, kind: output, shape index: {}]  }
   0x1   :  { %11 = vsyncpa [#allocation4], 0  ;;  %s562_s18 = smov [#allocation2]  }
   0x2   :  { %s17_s19 = sshll.u32 %s562_s18, 4  ;;  %s18_s19 = int_to_ptr.vmem [resolvable:$true] %s17_s19 }
   0x3   :  { %s526_s20 = scalar_lea.vmem %s18_s19, 2048  ;;  %p531_p1 = scmp.lt.s32.totalorder %s18_s19, %s18_s19 }
   0x4   :  { %p527_p0 = scmp.ne.s32.totalorder %s18_s19, %s526_s20  ;;  %p532_p2 = scmp.lt.s32.totalorder %s526_s20, %s526_s20 }
   0x6   :  { %p533_p3 = por %p532_p2, %p531_p1 }
   0x8   :  { %p534_p4 = pnand %p533_p3, %p527_p0 }
   0xa   :  { %537 = shalt.err (!%p534_p4)
}
   0xb   :  { %s563_s21 = smov 256   ;;  %s564_s22 = smov 16  }
   0xc   :  { %23 = dma.hbm_to_vmem [thread:$0]  %s733_s0, 2048, %s18_s19, [#allocation3], %s563_s21, %s563_s21, %s564_s22  }
   0xd   :  { %558 = dma.done.wait [#allocation3], 2048  }
   0xe   :  { %559 = vsyncadd [#allocation3], 4294965248  ;;  %v604_v0 = vld [vmem:[#allocation2 + $0x40] sm:$0xff]  ;;  %v606_v1 = vld [vmem:[#allocation2 + $0x48] sm:$0xff]  ;;  %v565_v32 = vmov 0.0   ;;  %vm566_vm0 = vmmov 0   ;;  %v115_v42 = vlaneseq }
   0xf   :  { %v608_v2 = vld [vmem:[#allocation2] sm:$0xff]  ;;  %v87_v3 = vadd.f32 %v606_v1, %v604_v0  ;;  %v612_v4 = vld [vmem:[#allocation2 + $0x8] sm:$0xff]  ;;  %v614_v5 = vld [vmem:[#allocation2 + $0x50] sm:$0xff]  ;;  %v63_v21 = vmax.f32 %v604_v0, %v606_v1  ;;  %492 = vmatprep.subr.mxu0 %v565_v32  ;;  %503 = vmatprep.subr.mxu1 %v565_v32  ;;  %vm126_vm1 = vcmask 130112   ;;  %vm133_vm2 = vcmask 195712  }
  0x10   :  { %v616_v6 = vld [vmem:[#allocation2 + $0x58] sm:$0xff]  ;;  %v75_v7 = vadd.f32 %v612_v4, %v608_v2  ;;  %v620_v8 = vld [vmem:[#allocation2 + $0x10] sm:$0xff]  ;;  %v628_v12 = vld [vmem:[#allocation2 + $0x60] sm:$0xff]  ;;  %v51_v19 = vmax.f32 %v608_v2, %v612_v4  ;;  %500 = vmatprep.mubr.msk.f32.mxu0 %vm566_vm0, %v565_v32  ;;  %505 = vmatprep.mubr.msk.f32.mxu1 %vm566_vm0, %v565_v32  ;;  %v116_v45 = vand.u32 127, %v115_v42  ;;  %v680_v47 = vshrl.u32 %v115_v42, 7 }
  0x11   :  { %v622_v9 = vld [vmem:[#allocation2 + $0x18] sm:$0xff]  ;;  %88 = vadd.xlane.f32.xlu1 %v87_v3  ;;  %v90_v10 = vadd.f32 %v616_v6, %v614_v5  ;;  %v630_v13 = vld [vmem:[#allocation2 + $0x68] sm:$0xff]  ;;  %v632_v14 = vld [vmem:[#allocation2 + $0x20] sm:$0xff]  ;;  %v66_v20 = vmax.f32 %v614_v5, %v616_v6  ;;  %vm140_vm3 = vcmask 261312   ;;  %vm161_vm4 = vcmask 1041409  }
  0x12   :  { %76 = vadd.xlane.f32.xlu0 %v75_v7  ;;  %v78_v11 = vadd.f32 %v622_v9, %v620_v8  ;;  %v634_v15 = vld [vmem:[#allocation2 + $0x28] sm:$0xff]  ;;  %v93_v16 = vadd.f32 %v630_v13, %v628_v12  ;;  %v54_v18 = vmax.f32 %v620_v8, %v622_v9  ;;  %v648_v22 = vld [vmem:[#allocation2 + $0x70] sm:$0xff]  ;;  %v650_v23 = vld [vmem:[#allocation2 + $0x78] sm:$0xff]  ;;  %v69_v28 = vmax.f32 %v628_v12, %v630_v13 }
  0x13   :  { %v81_v17 = vadd.f32 %v634_v15, %v632_v14  ;;  %v652_v24 = vld [vmem:[#allocation2 + $0x30] sm:$0xff]  ;;  %v654_v25 = vld [vmem:[#allocation2 + $0x38] sm:$0xff]  ;;  %v96_v26 = vadd.f32 %v650_v23, %v648_v22  ;;  %v57_v29 = vmax.f32 %v632_v14, %v634_v15  ;;  %v72_v30 = vmax.f32 %v648_v22, %v650_v23  ;;  %v216_v35 = vld [vmem:[%s734_s1 + $0x8] sm:$0xff] }
  0x14   :  { %v84_v27 = vadd.f32 %v654_v25, %v652_v24  ;;  %v60_v31 = vmax.f32 %v652_v24, %v654_v25  ;;  %v218_v33 = vld [vmem:[%s734_s1 + $0x18] sm:$0xff]  ;;  %v217_v34 = vld [vmem:[%s734_s1 + $0x10] sm:$0xff]  ;;  %v215_v36 = vld [vmem:[%s734_s1] sm:$0xff]  ;;  %v121_v48 = vadd.s32 4294967288, %v116_v45  ;;  %v128_v49 = vadd.s32 4294967280, %v116_v45 }
  0x15   :  { %91 = vadd.xlane.f32.xlu1 %v90_v10  ;;  %493 = vmatpush3.msra.mxu0 %v218_v33  ;;  %v135_v52 = vadd.s32 4294967272, %v116_v45  ;;  %v119_v53 = vsub.s32 %v116_v45, %v680_v47  ;;  %vm210_vm5 = vcmask 1043459   ;;  %vm213_vm6 = vcmask 1041408  }
  0x16   :  { %79 = vadd.xlane.f32.xlu0 %v78_v11  ;;  %494 = vmatprep.subr.mxu0 %v565_v32  ;;  %v124_v54 = vsub.s32 %v121_v48, %v680_v47  ;;  %v131_v56 = vsub.s32 %v128_v49, %v680_v47  ;;  %vm228_vm7 = vcmask 261120   ;;  %vm309_vm8 = vcmask 64512  }
  0x17   :  { %495 = vmatpush3.msra.mxu0 %v217_v34  ;;  %v138_v3 = vsub.s32 %v135_v52, %v680_v47 }
  0x18   :  { %496 = vmatprep.subr.mxu0 %v565_v32 }
  0x19   :  { %94 = vadd.xlane.f32.xlu1 %v93_v16  ;;  %497 = vmatpush3.msra.mxu0 %v216_v35 }
  0x1a   :  { %82 = vadd.xlane.f32.xlu0 %v81_v17  ;;  %498 = vmatprep.subr.mxu0 %v565_v32 }
  0x1b   :  { %499 = vmatpush3.msra.mxu0 %v215_v36 }
  0x1d   :  { %55 = vmax.xlane.f32.xlu1 %v54_v18 }
  0x1e   :  { %52 = vmax.xlane.f32.xlu0 %v51_v19 }
  0x21   :  { %67 = vmax.xlane.f32.xlu1 %v66_v20 }
  0x22   :  { %64 = vmax.xlane.f32.xlu0 %v63_v21 }
  0x25   :  { %97 = vadd.xlane.f32.xlu1 %v96_v26 }
  0x26   :  { %85 = vadd.xlane.f32.xlu0 %v84_v27 }
  0x29   :  { %70 = vmax.xlane.f32.xlu1 %v69_v28 }
  0x2a   :  { %58 = vmax.xlane.f32.xlu0 %v57_v29 }
  0x2d   :  { %73 = vmax.xlane.f32.xlu1 %v72_v30 }
  0x2e   :  { %61 = vmax.xlane.f32.xlu0 %v60_v31 }
  0x9a   :  { %v89_v37 = vpop.xlane.xlu1 %88 }
  0x9b   :  { %v77_v38 = vpop.xlane.xlu0 %76  ;;  %v103_v57 = vmul.f32 0.00390625, %v89_v37 }
  0x9c   :  { %v99_v63 = vmul.f32 0.00390625, %v77_v38 }
  0x9d   :  { %v194_v16 = vrot.slane %v103_v57, %v119_v53 }
  0x9e   :  { %v92_v39 = vpop.xlane.xlu1 %91  ;;  %v175_v30 = vrot.slane %v99_v63, %v119_v53 }
  0x9f   :  { %v80_v40 = vpop.xlane.xlu0 %79  ;;  %v104_v55 = vmul.f32 0.00390625, %v92_v39 }
  0xa0   :  { %v100_v58 = vmul.f32 0.00390625, %v80_v40 }
  0xa1   :  { %v198_v11 = vrot.slane %v104_v55, %v124_v54  ;;  %v220_v55 = vld [vmem:[%s736_s3] sm:$0xff] }
  0xa2   :  { %v95_v41 = vpop.xlane.xlu1 %94  ;;  %v179_v17 = vrot.slane %v100_v58, %v124_v54  ;;  %504 = vmatpush3.msra.mxu1 %v220_v55 }
  0xa3   :  { %v83_v43 = vpop.xlane.xlu0 %82  ;;  %v105_v59 = vmul.f32 0.00390625, %v95_v41  ;;  %v199_v34 = vsel %vm126_vm1, %v198_v11, %v194_v16 }
  0xa4   :  { %v101_v60 = vmul.f32 0.00390625, %v83_v43  ;;  %v180_v36 = vsel %vm126_vm1, %v179_v17, %v175_v30 }
  0xa5   :  { %v203_v18 = vrot.slane %v105_v59, %v131_v56 }
  0xa6   :  { %v56_v44 = vpop.xlane.xlu1 %55  ;;  %v184_v19 = vrot.slane %v101_v60, %v131_v56 }
  0xa7   :  { %v53_v46 = vpop.xlane.xlu0 %52  ;;  %v125_v21 = vrot.slane %v56_v44, %v124_v54  ;;  %v204_v37 = vsel %vm133_vm2, %v203_v18, %v199_v34  ;;  %v395_v18 = vsub.s32 0, %v680_v47 }
  0xa8   :  { %v120_v26 = vrot.slane %v53_v46, %v119_v53  ;;  %v185_v39 = vsel %vm133_vm2, %v184_v19, %v180_v36 }
  0xaa   :  { %v68_v50 = vpop.xlane.xlu1 %67  ;;  %v127_v40 = vsel %vm126_vm1, %v125_v21, %v120_v26  ;;  %v414_v21 = vsub.s32 1, %v680_v47 }
  0xab   :  { %v65_v51 = vpop.xlane.xlu0 %64  ;;  %v149_v27 = vrot.slane %v68_v50, %v124_v54 }
  0xac   :  { %v145_v28 = vrot.slane %v65_v51, %v119_v53 }
  0xae   :  { %v98_v61 = vpop.xlane.xlu1 %97  ;;  %v150_v41 = vsel %vm126_vm1, %v149_v27, %v145_v28 }
  0xaf   :  { %v86_v62 = vpop.xlane.xlu0 %85  ;;  %v106_v7 = vmul.f32 0.00390625, %v98_v61  ;;  %v482_v61 = vld [vmem:[%s737_s4] ss:$0 sm:$0xff] }
  0xb0   :  { %v102_v10 = vmul.f32 0.00390625, %v86_v62 }
  0xb1   :  { %v208_v31 = vrot.slane %v106_v7, %v138_v3 }
  0xb2   :  { %v71_v20 = vpop.xlane.xlu1 %70  ;;  %v189_v32 = vrot.slane %v102_v10, %v138_v3 }
  0xb3   :  { %v59_v29 = vpop.xlane.xlu0 %58  ;;  %v154_v33 = vrot.slane %v71_v20, %v131_v56  ;;  %v209_v44 = vsel %vm140_vm3, %v208_v31, %v204_v37 }
  0xb4   :  { %v132_v35 = vrot.slane %v59_v29, %v131_v56  ;;  %v190_v45 = vsel %vm140_vm3, %v189_v32, %v185_v39  ;;  %v480_v56 = vld [vmem:[%s735_s2] ss:$0 sm:$0xff]  ;;  %s567_s2 = smov [#allocation5]  }
  0xb5   :  { %v155_v46 = vsel %vm133_vm2, %v154_v33, %v150_v41  ;;  %v211_v53 = vsel %vm210_vm5, %v209_v44, %v190_v45  ;;  %s468_s3 = sshll.u32 %s567_s2, 4  ;;  %s469_s3 = int_to_ptr.vmem [resolvable:$true] %s468_s3 }
  0xb6   :  { %v74_v38 = vpop.xlane.xlu1 %73  ;;  %v134_v49 = vsel %vm133_vm2, %v132_v35, %v127_v40  ;;  %s538_s4 = scalar_lea.vmem %s469_s3, 2048  ;;  %p543_p6 = scmp.lt.s32.totalorder %s469_s3, %s469_s3 }
  0xb7   :  { %v159_v42 = vrot.slane %v74_v38, %v138_v3  ;;  %v62_v43 = vpop.xlane.xlu0 %61  ;;  %p539_p5 = scmp.ne.s32.totalorder %s469_s3, %s538_s4  ;;  %p544_p7 = scmp.lt.s32.totalorder %s538_s4, %s538_s4 }
  0xb8   :  { %v139_v48 = vrot.slane %v62_v43, %v138_v3 }
  0xb9   :  { %v160_v50 = vsel %vm140_vm3, %v159_v42, %v155_v46  ;;  %p545_p8 = por %p544_p7, %p543_p6 }
  0xba   :  { %v141_v51 = vsel %vm140_vm3, %v139_v48, %v134_v49 }
  0xbb   :  { %v162_v52 = vsel %vm161_vm4, %v160_v50, %v141_v51  ;;  %p546_p9 = pnand %p545_p8, %p539_p5 }
  0xbc   :  { %v214_v54 = vsel %vm213_vm6, %v162_v52, %v211_v53 }
  0xbd   :  { %501 = vmatmul.mubr.msk.f32.vlgmr.msra.gmra.mxu0 %vm228_vm7, %v214_v54 }
 0x17d   :  { %v298_v57 = vpop.f32.mrf.mxu0 }
 0x17e   :  { %v299_v58 = vadd.f32 %v480_v56, %v298_v57 }
 0x17f   :  { %v502_v59 = vpop.f32.mrf.mxu0 }
 0x180   :  { %v302_v60 = vmax.f32 %v299_v58, 0.0 }
 0x182   :  { %506 = vmatmul.mubr.msk.f32.vlgmr.msra.gmra.mxu1 %vm309_vm8, %v302_v60 }
 0x242   :  { %v379_v62 = vpop.f32.mrf.mxu1 }
 0x243   :  { %v380_v63 = vadd.f32 %v482_v61, %v379_v62 }
 0x244   :  { %v507_v3 = vpop.f32.mrf.mxu1 }
 0x245   :  { %v384_v7 = vrot.slane %v380_v63, 2 }
 0x247   :  { %v386_v10 = vadd.f32 %v384_v7, %v380_v63 }
 0x249   :  { %v484_v11 = vmul.f32 -1.442695, %v386_v10 }
 0x24b   :  { %514 = vpow2.f32 %v484_v11 }
 0x258   :  { %v515_v16 = vpop.eup %514 }
 0x259   :  { %v390_v17 = vadd.f32 1.0, %v515_v16 }
 0x25b   :  { %516 = vrcp.f32 %v390_v17 }
 0x268   :  { %v517_v19 = vpop.eup %516 }
 0x269   :  { %v396_v20 = vrot.slane %v517_v19, %v395_v18  ;;  %v415_v26 = vrot.slane %v517_v19, %v414_v21 }
 0x26b   :  { %402 = vbcast.lane.b32.xlu1 %v396_v20, 264  ;;  %398 = vbcast.lane.b32.xlu0 %v396_v20, 256 }
 0x26f   :  { %406 = vbcast.lane.b32.xlu1 %v396_v20, 272  ;;  %417 = vbcast.lane.b32.xlu0 %v415_v26, 256 }
 0x273   :  { %410 = vbcast.lane.b32.xlu1 %v396_v20, 280  ;;  %425 = vbcast.lane.b32.xlu0 %v415_v26, 272 }
 0x277   :  { %421 = vbcast.lane.b32.xlu1 %v415_v26, 264 }
 0x27b   :  { %429 = vbcast.lane.b32.xlu1 %v415_v26, 280 }
 0x2dd   :  { %v403_v27 = vpop.permute.xlu1 %402  ;;  %v399_v28 = vpop.permute.xlu0 %398 }
 0x2de   :  { %v433_v29 = vmul.f32 %v403_v27, %v620_v8  ;;  %v434_v30 = vmul.f32 %v403_v27, %v622_v9  ;;  %v431_v31 = vmul.f32 %v399_v28, %v608_v2  ;;  %v432_v32 = vmul.f32 %v399_v28, %v612_v4 }
 0x2e0   :  { %449 = vst [vmem:[#allocation5 + $0x10] sm:$0xff] %v433_v29  ;;  %450 = vst [vmem:[#allocation5 + $0x18] sm:$0xff] %v434_v30 }
 0x2e1   :  { %447 = vst [vmem:[#allocation5] sm:$0xff] %v431_v31  ;;  %448 = vst [vmem:[#allocation5 + $0x8] sm:$0xff] %v432_v32  ;;  %v407_v47 = vpop.permute.xlu1 %406  ;;  %v418_v33 = vpop.permute.xlu0 %417 }
 0x2e2   :  { %v435_v34 = vmul.f32 %v407_v47, %v632_v14  ;;  %v436_v35 = vmul.f32 %v407_v47, %v634_v15  ;;  %v439_v36 = vmul.f32 %v418_v33, %v604_v0  ;;  %v440_v8 = vmul.f32 %v418_v33, %v606_v1 }
 0x2e4   :  { %451 = vst [vmem:[#allocation5 + $0x20] sm:$0xff] %v435_v34  ;;  %452 = vst [vmem:[#allocation5 + $0x28] sm:$0xff] %v436_v35 }
 0x2e5   :  { %455 = vst [vmem:[#allocation5 + $0x40] sm:$0xff] %v439_v36  ;;  %456 = vst [vmem:[#allocation5 + $0x48] sm:$0xff] %v440_v8  ;;  %v411_v2 = vpop.permute.xlu1 %410  ;;  %v426_v4 = vpop.permute.xlu0 %425 }
 0x2e6   :  { %v437_v9 = vmul.f32 %v411_v2, %v652_v24  ;;  %v438_v37 = vmul.f32 %v411_v2, %v654_v25  ;;  %v443_v38 = vmul.f32 %v426_v4, %v628_v12  ;;  %v444_v14 = vmul.f32 %v426_v4, %v630_v13 }
 0x2e8   :  { %453 = vst [vmem:[#allocation5 + $0x30] sm:$0xff] %v437_v9  ;;  %454 = vst [vmem:[#allocation5 + $0x38] sm:$0xff] %v438_v37 }
 0x2e9   :  { %459 = vst [vmem:[#allocation5 + $0x60] sm:$0xff] %v443_v38  ;;  %460 = vst [vmem:[#allocation5 + $0x68] sm:$0xff] %v444_v14  ;;  %v422_v0 = vpop.permute.xlu1 %421 }
 0x2ea   :  { %v441_v1 = vmul.f32 %v422_v0, %v614_v5  ;;  %v442_v15 = vmul.f32 %v422_v0, %v616_v6 }
 0x2ec   :  { %457 = vst [vmem:[#allocation5 + $0x50] sm:$0xff] %v441_v1  ;;  %458 = vst [vmem:[#allocation5 + $0x58] sm:$0xff] %v442_v15 }
 0x2ed   :  { %v430_v24 = vpop.permute.xlu1 %429 }
 0x2ee   :  { %v445_v25 = vmul.f32 %v430_v24, %v648_v22  ;;  %v446_v12 = vmul.f32 %v430_v24, %v650_v23 }
 0x2f0   :  { %461 = vst [vmem:[#allocation5 + $0x70] sm:$0xff] %v445_v25  ;;  %462 = vst [vmem:[#allocation5 + $0x78] sm:$0xff] %v446_v12 }
 0x2f1   :  { %549 = shalt.err (!%p546_p9)
}
 0x2f2   :  { %474 = dma.vmem_to_hbm [thread:$0]  %s469_s3, 2048, %s738_s5, [#allocation4], %s563_s21, %s563_s21, %s564_s22  }
 0x2f3   :  { %560 = dma.done.wait [#allocation4], 2048  }
 0x2f4   :  { %561 = vsyncadd [#allocation4], 4294965248 }
 0x2f5   :  { %478 = vsyncpa [#allocation3], 1 }
 0x2f6   :  { %479 = vsyncpa [#allocation4], 1 }

</bundles_post_ra>
